<compile_context>
chip_gen: v5e
topology: v5e:2x2
jax: 0.10.0
libtpu: 0.0.40
codegen_flags: <defaults>
</compile_context>

<pallas_src>
import functools

import jax
import jax.numpy as jnp
from jax.experimental import pallas as pl
from jax.experimental.pallas import tpu as pltpu


def _conv1x1_kernel(x_ref, w_ref, b_ref, o_ref):
    """x_ref: (1, C_in, tn), w_ref: (C_out, C_in), b_ref: (C_out, 1),
    o_ref: (1, C_out, tn).  Spatial on lanes; VPU broadcast-FMA over C_in."""
    x = x_ref[0].astype(jnp.float32)        # (C_in, tn)
    w = w_ref[...].astype(jnp.float32)      # (C_out, C_in)
    c_in = x.shape[0]

    # out[c, s] = sum_k w[c, k] * x[k, s]  -- unrolled over the tiny C_in axis.
    # Broadcasts (C_out,1)*(1,tn) lower to plain VPU mul/add; the MXU stays idle
    # (K=4 would waste >99% of it and add MRF drain latency).
    acc = w[:, 0:1] * x[0:1, :]
    for k in range(1, c_in):
        acc = acc + w[:, k : k + 1] * x[k : k + 1, :]
    acc = acc + b_ref[...].astype(jnp.float32)   # lane-broadcast bias

    o_ref[0] = acc.astype(o_ref.dtype)


def _pick_spatial_tile(hw, n_batch, *, max_tile=8192, min_tile=512, target_steps=8):
    """Pick a lane-dense spatial tile that divides hw exactly.

    Prefers multiples of 128 (unmasked, lane-dense vregs), large enough to
    amortize per-step overhead, but keeps >= ~target_steps grid iterations so
    v7x's two TensorCores both get work.  Falls back to the full spatial extent
    (always a legal block: equals the array dim) when hw is not 128-aligned.
    """
    if hw % 128 != 0 or hw <= min_tile:
        return hw
    want = max(1, target_steps // max(n_batch, 1))
    t_target = max(min_tile, min(max_tile, hw // want))
    t = (t_target // 128) * 128
    while t >= 128:
        if hw % t == 0:
            return t
        t -= 128
    return hw


def conv1x1_pallas(x3, w_mat, b2, *, tn):
    """x3: (N, C_in, H*W), w_mat: (C_out, C_in), b2: (C_out, 1) -> (N, C_out, H*W)."""
    N, C_in, HW = x3.shape
    C_out = w_mat.shape[0]
    assert HW % tn == 0  # guaranteed by _pick_spatial_tile

    flops = 2 * N * HW * C_in * C_out
    bytes_accessed = 4 * (N * HW * C_in + N * HW * C_out + C_in * C_out + C_out)

    return pl.pallas_call(
        _conv1x1_kernel,
        out_shape=jax.ShapeDtypeStruct((N, C_out, HW), x3.dtype),
        grid_spec=pltpu.PrefetchScalarGridSpec(
            num_scalar_prefetch=0,
            grid=(N, HW // tn),
            in_specs=[
                pl.BlockSpec((1, C_in, tn), lambda n, t: (n, 0, t)),
                pl.BlockSpec((C_out, C_in), lambda n, t: (0, 0)),
                pl.BlockSpec((C_out, 1), lambda n, t: (0, 0)),
            ],
            out_specs=pl.BlockSpec((1, C_out, tn), lambda n, t: (n, 0, t)),
        ),
        compiler_params=pltpu.CompilerParams(
            dimension_semantics=("parallel", "parallel"),
        ),
        cost_estimate=pl.CostEstimate(
            flops=flops, transcendentals=0, bytes_accessed=bytes_accessed
        ),
    )(x3, w_mat, b2)


def upsample_forward(x_nchw, w_conv, b_conv, factor=2):
    """Full UpSample.forward. x_nchw: (N, C_in, H, W) -> (N, C_in, H*r, W*r) NCHW."""
    N, C_in, H, W = x_nchw.shape
    C_out = w_conv.shape[0]          # = C_in * factor * factor
    HW = H * W
    r = factor

    # NCHW is already (channel, spatial)-major: a free reshape, no transpose.
    x3 = x_nchw.reshape(N, C_in, HW)
    w_mat = w_conv.reshape(C_out, C_in)      # (C_out, C_in, 1, 1) -> (C_out, C_in)
    b2 = b_conv.reshape(C_out, 1)

    tn = _pick_spatial_tile(HW, N)
    feat = conv1x1_pallas(x3, w_mat, b2, tn=tn)       # (N, C_out, HW)

    # PixelShuffle: out[n, c, h*r+i, w*r+j] = feat[n, c*r*r + i*r + j, h, w]
    C = C_out // (r * r)
    f = feat.reshape(N, C, r, r, H, W)                 # (n, c, i, j, h, w)
    f = jnp.transpose(f, (0, 1, 4, 2, 5, 3))           # (n, c, h, i, w, j)
    return f.reshape(N, C, H * r, W * r)


def init_params(key, n_chan, factor=2, dtype=jnp.float32):
    out_chan = n_chan * factor * factor
    kw, kb = jax.random.split(key)
    # xavier_normal_ on conv weight (out_chan, n_chan, 1, 1), gain=1.0
    std = (2.0 / (n_chan + out_chan)) ** 0.5
    w = std * jax.random.normal(kw, (out_chan, n_chan, 1, 1), dtype=dtype)
    # PyTorch default conv bias init: U(-1/sqrt(fan_in), 1/sqrt(fan_in))
    bound = 1.0 / (n_chan ** 0.5)
    b = jax.random.uniform(kb, (out_chan,), dtype=dtype, minval=-bound, maxval=bound)
    return w, b


def reference_forward(x_nchw, w_conv, b_conv, factor=2):
    """Pure-JAX reference (lax conv + pixel shuffle) for a sanity check."""
    feat = jax.lax.conv_general_dilated(
        x_nchw, w_conv, window_strides=(1, 1), padding="VALID",
        dimension_numbers=("NCHW", "OIHW", "NCHW"))
    feat = feat + b_conv.reshape(1, -1, 1, 1)
    N, CRR, H, W = feat.shape
    r = factor
    C = CRR // (r * r)
    f = feat.reshape(N, C, r, r, H, W)
    f = jnp.transpose(f, (0, 1, 4, 2, 5, 3))
    return f.reshape(N, C, H * r, W * r)


if __name__ == "__main__":
    key = jax.random.PRNGKey(0)
    k_x, k_p = jax.random.split(key)

    N, C_in, H, W = 2, 4, 16, 16
    factor = 2

    x = jax.random.normal(k_x, (N, C_in, H, W), dtype=jnp.float32)
    w_conv, b_conv = init_params(k_p, C_in, factor)

    fwd = jax.jit(functools.partial(upsample_forward, factor=factor))
    out = jax.block_until_ready(fwd(x, w_conv, b_conv))

    ref = jax.block_until_ready(reference_forward(x, w_conv, b_conv, factor))
    assert out.shape == (N, C_in, H * factor, W * factor), out.shape
    assert jnp.allclose(out, ref, atol=1e-5, rtol=1e-5), "mismatch vs reference"

    print("KERNEL_OK")
</pallas_src>

<mosaic_0001>
module attributes {stable_mosaic.version = 11 : i64} {
  func.func @_conv1x1_kernel(%arg0: i32, %arg1: i32, %arg2: memref<1x4x256xf32, #tpu.memory_space<vmem>>, %arg3: memref<16x4xf32, #tpu.memory_space<vmem>>, %arg4: memref<16x1xf32, #tpu.memory_space<vmem>>, %arg5: memref<1x16x256xf32, #tpu.memory_space<vmem>>) attributes {dimension_semantics = [#tpu.dimension_semantics<parallel>, #tpu.dimension_semantics<parallel>], iteration_bounds = array<i64: 2, 1>, scalar_prefetch = 0 : i64, scratch_operands = 0 : i64, tpu.core_type = #tpu.core_type<tc>, window_params = [{transform_indices = @transform_0, window_bounds = array<i64: 1, 4, 256>}, {pipeline_mode = #tpu.pipeline_mode<synchronous>, transform_indices = @transform_1, window_bounds = array<i64: 16, 4>}, {pipeline_mode = #tpu.pipeline_mode<synchronous>, transform_indices = @transform_2, window_bounds = array<i64: 16, 1>}, {transform_indices = @transform_3, window_bounds = array<i64: 1, 16, 256>}]} {
    %c0 = arith.constant 0 : index
    %c0_0 = arith.constant 0 : index
    %c0_1 = arith.constant 0 : index
    %0 = vector.load %arg2[%c0, %c0_0, %c0_1] : memref<1x4x256xf32, #tpu.memory_space<vmem>>, vector<1x4x256xf32>
    %1 = vector.shape_cast %0 : vector<1x4x256xf32> to vector<4x256xf32>
    %c0_2 = arith.constant 0 : index
    %c0_3 = arith.constant 0 : index
    %2 = vector.load %arg3[%c0_2, %c0_3] : memref<16x4xf32, #tpu.memory_space<vmem>>, vector<16x4xf32>
    %3 = vector.extract_strided_slice %2 {offsets = [0, 0], sizes = [16, 1], strides = [1, 1]} : vector<16x4xf32> to vector<16x1xf32>
    %4 = vector.extract_strided_slice %1 {offsets = [0, 0], sizes = [1, 256], strides = [1, 1]} : vector<4x256xf32> to vector<1x256xf32>
    %5 = vector.broadcast %3 : vector<16x1xf32> to vector<16x256xf32>
    %6 = vector.broadcast %4 : vector<1x256xf32> to vector<16x256xf32>
    %7 = arith.mulf %5, %6 : vector<16x256xf32>
    %8 = vector.extract_strided_slice %2 {offsets = [0, 1], sizes = [16, 1], strides = [1, 1]} : vector<16x4xf32> to vector<16x1xf32>
    %9 = vector.extract_strided_slice %1 {offsets = [1, 0], sizes = [1, 256], strides = [1, 1]} : vector<4x256xf32> to vector<1x256xf32>
    %10 = vector.broadcast %8 : vector<16x1xf32> to vector<16x256xf32>
    %11 = vector.broadcast %9 : vector<1x256xf32> to vector<16x256xf32>
    %12 = arith.mulf %10, %11 : vector<16x256xf32>
    %13 = arith.addf %7, %12 : vector<16x256xf32>
    %14 = vector.extract_strided_slice %2 {offsets = [0, 2], sizes = [16, 1], strides = [1, 1]} : vector<16x4xf32> to vector<16x1xf32>
    %15 = vector.extract_strided_slice %1 {offsets = [2, 0], sizes = [1, 256], strides = [1, 1]} : vector<4x256xf32> to vector<1x256xf32>
    %16 = vector.broadcast %14 : vector<16x1xf32> to vector<16x256xf32>
    %17 = vector.broadcast %15 : vector<1x256xf32> to vector<16x256xf32>
    %18 = arith.mulf %16, %17 : vector<16x256xf32>
    %19 = arith.addf %13, %18 : vector<16x256xf32>
    %20 = vector.extract_strided_slice %2 {offsets = [0, 3], sizes = [16, 1], strides = [1, 1]} : vector<16x4xf32> to vector<16x1xf32>
    %21 = vector.extract_strided_slice %1 {offsets = [3, 0], sizes = [1, 256], strides = [1, 1]} : vector<4x256xf32> to vector<1x256xf32>
    %22 = vector.broadcast %20 : vector<16x1xf32> to vector<16x256xf32>
    %23 = vector.broadcast %21 : vector<1x256xf32> to vector<16x256xf32>
    %24 = arith.mulf %22, %23 : vector<16x256xf32>
    %25 = arith.addf %19, %24 : vector<16x256xf32>
    %c0_4 = arith.constant 0 : index
    %c0_5 = arith.constant 0 : index
    %26 = vector.load %arg4[%c0_4, %c0_5] : memref<16x1xf32, #tpu.memory_space<vmem>>, vector<16x1xf32>
    %27 = vector.broadcast %26 : vector<16x1xf32> to vector<16x256xf32>
    %28 = arith.addf %25, %27 : vector<16x256xf32>
    %c0_6 = arith.constant 0 : index
    %c0_7 = arith.constant 0 : index
    %c0_8 = arith.constant 0 : index
    %29 = vector.load %arg5[%c0_6, %c0_7, %c0_8] : memref<1x16x256xf32, #tpu.memory_space<vmem>>, vector<1x16x256xf32>
    %30 = vector.shape_cast %29 : vector<1x16x256xf32> to vector<16x256xf32>
    %31 = vector.shape_cast %28 : vector<16x256xf32> to vector<1x16x256xf32>
    tpu.vector_store %arg5[%c0_6, %c0_7, %c0_8], %31 {strides = array<i32>} : memref<1x16x256xf32, #tpu.memory_space<vmem>>, vector<1x16x256xf32>,
    return
  }
  func.func @transform_0(%arg0: i32, %arg1: i32) -> (i32, i32, i32) {
    %c0_i32 = arith.constant 0 : i32
    %c0_i32_0 = arith.constant 0 : i32
    return %arg0, %c0_i32, %arg1 : i32, i32, i32
  }
  func.func @transform_1(%arg0: i32, %arg1: i32) -> (i32, i32) {
    %c0_i32 = arith.constant 0 : i32
    %c0_i32_0 = arith.constant 0 : i32
    %c0_i32_1 = arith.constant 0 : i32
    return %c0_i32, %c0_i32_0 : i32, i32
  }
  func.func @transform_2(%arg0: i32, %arg1: i32) -> (i32, i32) {
    %c0_i32 = arith.constant 0 : i32
    %c0_i32_0 = arith.constant 0 : i32
    %c0_i32_1 = arith.constant 0 : i32
    return %c0_i32, %c0_i32_0 : i32, i32
  }
  func.func @transform_3(%arg0: i32, %arg1: i32) -> (i32, i32, i32) {
    %c0_i32 = arith.constant 0 : i32
    %c0_i32_0 = arith.constant 0 : i32
    return %arg0, %c0_i32, %arg1 : i32, i32, i32
  }
}

</mosaic_0001>

<bundles_post_ra>
// kernel: upsample_forward.1
= control target key start
LH: loop header
LB: loop body
LE: loop exit
PB: predicated region body
PF: predicated region fallthrough
CT: control target
= control target key end

     0   :  { %s504_s12 = smov 0   ;;  %s506_s13 = smov 0   ;;  %s557_s0 = inlined_call_operand.vmem [shape: f32[2,4,256], index: 0, kind: input, shape index: {}]   ;;  %s558_s1 = inlined_call_operand.vmem [shape: f32[16,4], index: 1, kind: input, shape index: {}]   ;;  %s559_s2 = inlined_call_operand.vmem [shape: f32[16,1], index: 2, kind: input, shape index: {}]   ;;  %s560_s3 = inlined_call_operand.vmem [shape: f32[2,16,256], index: 3, kind: output, shape index: {}]  }
   0x1   :  { %s508_s14 = smov 0  }
   0x2 LB: > { %s25_s15 = sadd.s32 1, %s474_s13  ;;  %p411_p0 = scmp.ge.s32.totalorder %s478_s14, 1  ;;  %s478_s14 = sphi %s508_s14, %s13_s14   ;;  %s474_s13 = sphi %s506_s13, %s562_s13   ;;  %s470_s12 = sphi %s504_s12, %s561_s12  }
   0x3   : > { %p27_p1 = scmp.ge.s32.totalorder %s25_s15, 2  ;;  %p158_p2 = scmp.lt.s32.totalorder %s478_s14, 3 }
   0x5   : > { %s564_s15 = smov (%p27_p1, %s25_s15), 0  ;;  %p159_p3 = pnand %p411_p0, %p158_p2 }
   0x6   : > { %p191_p4 = scmp.lt.s32.totalorder (!%p159_p3), %s470_s12, 1 }
   0x7   : > { %162 = sbr.rel (%p159_p3) target bundleno = 159 (0x9f), region = 32 }
   0xc   : > { %v211_v0 = vld [vmem:[%s558_s1] sm:$0xff]  ;;  %v480_v1 = vmov 1   ;;  %v481_v2 = vmov 0   ;;  %v482_v3 = vmov 2   ;;  %v212_v4 = vld [vmem:[%s558_s1 + $0x8] sm:$0xff]  ;;  %v483_v5 = vmov 3  }
   0xd   : > { %449 = vset.pattern.permute.xlu1 %v480_v1  ;;  %448 = vset.pattern.permute.xlu0 %v481_v2  ;;  %v300_v6 = vld [vmem:[%s559_s2] sm:$0xff]  ;;  %v301_v7 = vld [vmem:[%s559_s2 + $0x8] sm:$0xff]  ;;  %s566_s12 = smov (!%p191_p4, %s470_s12), 1 }
   0xe   : > { %235 = vperm.xlu1 %449, %v211_v0   ;;  %215 = vperm.xlu0 %448, %v211_v0   ;;  %s418_s24 = sshll.u32 %s566_s12, 3  ;;  %s419_s28 = sshll.u32 %s566_s12, 5 }
   0xf   : > { %450 = vset.pattern.permute.xlu2 %v482_v3  ;;  %s198_s27 = scalar_lea.vmem %s557_s0, %s418_s24  ;;  %s208_s4 = scalar_lea.vmem %s560_s3, %s419_s28 }
  0x10   : > { %257 = vperm.xlu2 %450, %v211_v0   ;;  %v210_v8 = vld [vmem:[%s198_s27] sm:$0xff] }
  0x11   : > { %v242_v12 = vperm.slane %v210_v8, 1  ;;  %v243_v13 = vperm.slane %v210_v8, 5  ;;  %v224_v14 = vperm.slane %v210_v8, 0  ;;  %v225_v15 = vperm.slane %v210_v8, 4 }
  0x12   : > { %v264_v16 = vperm.slane %v210_v8, 2  ;;  %v265_v17 = vperm.slane %v210_v8, 6  ;;  %v286_v26 = vperm.slane %v210_v8, 3  ;;  %v287_v27 = vperm.slane %v210_v8, 7 }
  0x13   : > { %v246_v18 = vperm.slane %v242_v12, 1  ;;  %v247_v19 = vperm.slane %v243_v13, 1  ;;  %v228_v20 = vperm.slane %v224_v14, 0  ;;  %v229_v21 = vperm.slane %v225_v15, 0 }
  0x14   : > { %v268_v24 = vperm.slane %v264_v16, 2  ;;  %v269_v25 = vperm.slane %v265_v17, 2  ;;  %v290_v37 = vperm.slane %v286_v26, 3  ;;  %v291_v38 = vperm.slane %v287_v27, 3 }
  0x16   : > { %239 = vperm.xlu1 %449, %v212_v4   ;;  %220 = vperm.xlu0 %448, %v212_v4  }
  0x18   : > { %261 = vperm.xlu2 %450, %v212_v4  }
  0x1e   : > { %452 = vset.pattern.permute.xlu1 %v483_v5  ;;  %451 = vset.pattern.permute.xlu0 %v483_v5 }
  0x1f   : > { %283 = vperm.xlu1 %452, %v212_v4   ;;  %279 = vperm.xlu0 %451, %v211_v0  }
  0x20   : > { %453 = vset.pattern.permute.xlu2 %v481_v2 }
  0x21   : > { %304 = vperm.xlu2 %453, %v300_v6  }
  0x27   : > { %454 = vset.pattern.permute.xlu1 %v481_v2  ;;  %455 = vset.pattern.permute.xlu0 %v481_v2 }
  0x28   : > { %309 = vperm.xlu1 %454, %v301_v7  }
  0x6a   : > { %v258_v11 = vpop.permute.xlu2 %257 }
  0x6b   : > { %v270_v33 = vmul.f32 %v268_v24, %v258_v11  ;;  %v271_v34 = vmul.f32 %v269_v25, %v258_v11 }
  0x72   : > { %v262_v32 = vpop.permute.xlu2 %261 }
  0x73   : > { %v272_v51 = vmul.f32 %v268_v24, %v262_v32  ;;  %v273_v52 = vmul.f32 %v269_v25, %v262_v32 }
  0x7b   : > { %v305_v53 = vpop.permute.xlu2 %304 }
  0x80   : > { %v236_v9 = vpop.permute.xlu1 %235  ;;  %v216_v10 = vpop.permute.xlu0 %215 }
  0x81   : > { %v248_v28 = vmul.f32 %v246_v18, %v236_v9  ;;  %v249_v29 = vmul.f32 %v247_v19, %v236_v9  ;;  %v230_v30 = vmul.f32 %v228_v20, %v216_v10  ;;  %v231_v31 = vmul.f32 %v229_v21, %v216_v10 }
  0x83   : > { %v252_v35 = vadd.f32 %v248_v28, %v230_v30  ;;  %v253_v36 = vadd.f32 %v249_v29, %v231_v31 }
  0x85   : > { %v274_v45 = vadd.f32 %v270_v33, %v252_v35  ;;  %v275_v46 = vadd.f32 %v271_v34, %v253_v36 }
  0x88   : > { %v240_v22 = vpop.permute.xlu1 %239  ;;  %v221_v23 = vpop.permute.xlu0 %220 }
  0x89   : > { %v250_v39 = vmul.f32 %v246_v18, %v240_v22  ;;  %v251_v40 = vmul.f32 %v247_v19, %v240_v22  ;;  %v232_v41 = vmul.f32 %v228_v20, %v221_v23  ;;  %v233_v42 = vmul.f32 %v229_v21, %v221_v23 }
  0x8b   : > { %v254_v49 = vadd.f32 %v250_v39, %v232_v41  ;;  %v255_v50 = vadd.f32 %v251_v40, %v233_v42 }
  0x8d   : > { %v276_v60 = vadd.f32 %v272_v51, %v254_v49  ;;  %v277_v61 = vadd.f32 %v273_v52, %v255_v50 }
  0x91   : > { %v284_v43 = vpop.permute.xlu1 %283  ;;  %v280_v44 = vpop.permute.xlu0 %279 }
  0x92   : > { %v292_v47 = vmul.f32 %v290_v37, %v280_v44  ;;  %v293_v48 = vmul.f32 %v291_v38, %v280_v44  ;;  %v294_v56 = vmul.f32 %v290_v37, %v284_v43  ;;  %v295_v57 = vmul.f32 %v291_v38, %v284_v43 }
  0x94   : > { %v296_v54 = vadd.f32 %v292_v47, %v274_v45  ;;  %v297_v55 = vadd.f32 %v293_v48, %v275_v46  ;;  %v298_v62 = vadd.f32 %v294_v56, %v276_v60  ;;  %v299_v63 = vadd.f32 %v295_v57, %v277_v61 }
  0x96   : > { %v312_v58 = vadd.f32 %v305_v53, %v296_v54  ;;  %v313_v59 = vadd.f32 %v305_v53, %v297_v55 }
  0x98   : > { %316 = vst [vmem:[%s208_s4] sm:$0xff] %v312_v58 }
  0x99   : > { %317 = vst [vmem:[%s208_s4 + $0x8] sm:$0xff] %v313_v59 }
  0x9a   : > { %v310_v0 = vpop.permute.xlu1 %309 }
  0x9b   : > { %v314_v1 = vadd.f32 %v310_v0, %v298_v62  ;;  %v315_v2 = vadd.f32 %v310_v0, %v299_v63 }
  0x9d   : > { %318 = vst [vmem:[%s208_s4 + $0x10] sm:$0xff] %v314_v1 }
  0x9e   : > { %319 = vst [vmem:[%s208_s4 + $0x18] sm:$0xff] %v315_v2 }
  0x9f PF: > { %s13_s14 = sadd.s32 1, %s478_s14   ;;  %s561_s12 = smov %s474_s13 }
  0xa0   : > { %p10_p5 = scmp.ge.s32.totalorder %s13_s14, 4   ;;  %s562_s13 = smov %s564_s15 }
  0xa2   :  { %12 = sbr.rel (!%p10_p5) target bundleno = 2 (0x2), region = 62 }

</bundles_post_ra>
